<compile_context>
chip_gen: v6e
topology: v6e:2x2x1
jax: 0.10.0
libtpu: 0.0.40
codegen_flags: <defaults>
</compile_context>

<pallas_src>
import functools

import jax
import jax.numpy as jnp
import numpy as np
from jax import lax
from jax.experimental import pallas as pl
from jax.experimental.pallas import tpu as pltpu


def _boundary_kernel(logits_ref, gt_ref, out_ref, *, theta0, theta, H, W):
    """Per-grid-step body: bn images, foreground channel only.

    logits_ref, gt_ref : (bn, Hp, Wp) native dtype, Hp % 8 == 0, Wp % 128 == 0
    out_ref            : (1, bn, 4) f32 -> [sum(pred_b*gt_b_ext), sum(pred_b),
                                            sum(pred_b_ext*gt_b), sum(gt_b)]
    """
    bn, Hp, Wp = logits_ref.shape
    f32 = jnp.float32

    # Hoisted once per grid step: index planes for all tap / validity masks.
    row_idx = lax.broadcasted_iota(jnp.int32, (Hp, Wp), 0)
    col_idx = lax.broadcasted_iota(jnp.int32, (Hp, Wp), 1)
    padded = (Hp, Wp) != (H, W)
    valid = (row_idx < H) & (col_idx < W) if padded else None

    def pool_same(plane, k):
        # Stride-1 'same' max-pool with -inf padding semantics (F.max_pool2d).
        # Each tap = one XLU roll + one VPU select + one VPU max, all in vregs.
        # Substituting 0 for out-of-image taps is exact ONLY because plane >= 0
        # and the window always contains its in-range centre; wrapped rows /
        # lanes are masked by the same "inside the real image" conditions.
        r = (k - 1) // 2
        rows = plane                                    # --- H (sublane) pass
        for d in range(1, r + 1):
            up = pltpu.roll(plane, (-d) % Hp, axis=0)   # out[i] = plane[i + d]
            rows = jnp.maximum(rows, jnp.where(row_idx < H - d, up, 0.0))
            dn = pltpu.roll(plane, d, axis=0)           # out[i] = plane[i - d]
            rows = jnp.maximum(rows, jnp.where(row_idx >= d, dn, 0.0))
        out = rows                                      # --- W (lane) pass
        for d in range(1, r + 1):
            lf = pltpu.roll(rows, (-d) % Wp, axis=1)    # out[j] = rows[j + d]
            out = jnp.maximum(out, jnp.where(col_idx < W - d, lf, 0.0))
            rt = pltpu.roll(rows, d, axis=1)            # out[j] = rows[j - d]
            out = jnp.maximum(out, jnp.where(col_idx >= d, rt, 0.0))
        return out

    def total(x):
        # (Hp, Wp) -> (1, 1): reduce sublanes (H) first, then the single
        # remaining row across lanes — no full-plane cross-lane reduction.
        return jnp.sum(jnp.sum(x, axis=0, keepdims=True), axis=1, keepdims=True)

    rows_out = []
    for b in range(bn):   # images are independent -> the scheduler interleaves
        # Foreground channel only (the background channel never reaches the
        # returned loss); native-dtype inputs are cast to f32 in-register.
        p1 = jax.nn.sigmoid(logits_ref[b].astype(f32))           # (Hp, Wp)
        g1 = (gt_ref[b].astype(f32) == 1.0).astype(f32)          # (Hp, Wp)

        one_m_pred = 1.0 - p1
        one_m_gt = 1.0 - g1

        gt_b = pool_same(one_m_gt, theta0) - one_m_gt
        pred_b = pool_same(one_m_pred, theta0) - one_m_pred
        if padded:   # pad region must contribute nothing to sums / products
            gt_b = jnp.where(valid, gt_b, 0.0)
            pred_b = jnp.where(valid, pred_b, 0.0)
        gt_b_ext = pool_same(gt_b, theta)
        pred_b_ext = pool_same(pred_b, theta)

        s0 = total(pred_b * gt_b_ext)   # numerator of P
        s1 = total(pred_b)              # denominator of P
        s2 = total(pred_b_ext * gt_b)   # numerator of R
        s3 = total(gt_b)                # denominator of R
        rows_out.append(jnp.concatenate([s0, s1, s2, s3], axis=1))   # (1, 4)

    out_ref[0] = jnp.concatenate(rows_out, axis=0)                   # (bn, 4)


# ----------------------------- wrapper ---------------------------------------
_LIVE_PLANES = 16   # conservative: p1, g1, 1-p, 1-g, gt_b, pred_b, *_ext,
                    # pooling temporaries, products, 2 int32 iota planes.


def _vmem_budget_bytes():
    try:
        info = pltpu.get_tpu_info()
        phys = int(getattr(info, "vmem_capacity_bytes", 64 << 20))
    except Exception:        # conservative fallback (64 MiB-class part)
        phys = 64 << 20
    return min((phys * 3) // 4, 96 << 20)


def _pick_bn(N, Hp, Wp, in_itemsize, budget):
    """Images folded per grid step: amortize per-step overhead for small images
    while keeping the real per-step footprint inside `budget` and grid_n >= 2
    so the 'parallel' axis can feed both v7x TensorCores."""
    live = _LIVE_PLANES * Hp * Wp * 4           # one image's in-flight planes

    def step_bytes(bn):
        return live + 2 * bn * Hp * Wp * in_itemsize   # + double-buffered inputs

    max_bn = 1 if N < 2 else min(8, N // 2)
    for cand in range(max_bn, 0, -1):
        if N % cand == 0 and step_bytes(cand) <= budget:
            return cand
    # TODO(synk): for prime / awkward N, pad the batch instead of degrading to 1.
    return 1


def boundary_loss(pred_logits, gt_mask, theta0=3, theta=5):
    """JAX/Pallas equivalent of BoundaryLoss.forward(pred_logits, gt_mask).

    Callers should pass inputs in narrow native dtypes (e.g. bf16 logits and
    int8/bool masks); the f32 cast happens inside the kernel, so input DMA —
    the only HBM traffic here — stays minimal.
    """
    N, C, H, W = pred_logits.shape
    assert C == 1, 'BoundaryLoss: predictions must have 1 channel'
    assert gt_mask.shape == (N, H, W)

    # Pad spatial dims to (8, 128) multiples so every roll / load / store is
    # tile-aligned; the pad region is masked out inside the kernel.
    Hp = ((H + 7) // 8) * 8
    Wp = ((W + 127) // 128) * 128
    logits3 = pred_logits.reshape(N, H, W)      # metadata-only reshape
    gt3 = gt_mask
    if (Hp, Wp) != (H, W):
        # TODO(synk): for W << 128 fold several images along the lane axis
        # instead of zero-padding, to avoid inflating input DMA bytes.
        logits3 = jnp.pad(logits3, ((0, 0), (0, Hp - H), (0, Wp - W)))
        gt3 = jnp.pad(gt3, ((0, 0), (0, Hp - H), (0, Wp - W)))

    vmem_limit = _vmem_budget_bytes()
    in_itemsize = logits3.dtype.itemsize + gt3.dtype.itemsize
    bn = _pick_bn(N, Hp, Wp, in_itemsize, budget=vmem_limit // 2)
    grid_n = N // bn
    # TODO(synk): for very large H*W add an H-tiled grid axis with a
    # ((theta0-1)//2 + (theta-1)//2)-row halo so the per-step footprint stays
    # VMEM-resident on 64 MiB-class parts (v7x) even when N is small.

    kernel = functools.partial(
        _boundary_kernel, theta0=theta0, theta=theta, H=H, W=W)

    sums = pl.pallas_call(
        kernel,
        out_shape=jax.ShapeDtypeStruct((grid_n, bn, 4), jnp.float32),
        grid=(grid_n,),
        in_specs=[
            pl.BlockSpec((bn, Hp, Wp), lambda n: (n, 0, 0)),
            pl.BlockSpec((bn, Hp, Wp), lambda n: (n, 0, 0)),
        ],
        out_specs=pl.BlockSpec((1, bn, 4), lambda n: (n, 0, 0)),
        compiler_params=pltpu.CompilerParams(
            dimension_semantics=("parallel",),
            vmem_limit_bytes=int(vmem_limit),
        ),
    )(logits3, gt3)

    # Tiny per-image scalar glue: precision / recall / BF1 / mean loss
    # (foreground channel only — identical to mean(1 - BF1[:, 1]) in the spec).
    sums = sums.reshape(N, 4)
    P = sums[:, 0] / (sums[:, 1] + 1e-7)
    R = sums[:, 2] / (sums[:, 3] + 1e-7)
    BF1 = 2.0 * P * R / (P + R + 1e-7)
    return jnp.mean(1.0 - BF1)


# ------------------------- pure-JAX reference (for validation) ---------------
def _maxpool_ref(x, k):
    pad = (k - 1) // 2
    return lax.reduce_window(
        x, -jnp.inf, lax.max,
        window_dimensions=(1, 1, k, k), window_strides=(1, 1, 1, 1),
        padding=((0, 0), (0, 0), (pad, pad), (pad, pad)))


def boundary_loss_ref(pred_logits, gt_mask, theta0=3, theta=5):
    # Full two-channel reference, mirroring the PyTorch module exactly.
    pred = jax.nn.sigmoid(pred_logits.astype(jnp.float32))
    pred = jnp.concatenate([1.0 - pred, pred], axis=1)
    gt1h = jnp.stack([(gt_mask == 0).astype(jnp.float32),
                      (gt_mask == 1).astype(jnp.float32)], axis=1)
    gt_b = _maxpool_ref(1.0 - gt1h, theta0) - (1.0 - gt1h)
    pred_b = _maxpool_ref(1.0 - pred, theta0) - (1.0 - pred)
    gt_b_ext = _maxpool_ref(gt_b, theta)
    pred_b_ext = _maxpool_ref(pred_b, theta)
    N = pred.shape[0]
    gt_b = gt_b.reshape(N, 2, -1)
    pred_b = pred_b.reshape(N, 2, -1)
    gt_b_ext = gt_b_ext.reshape(N, 2, -1)
    pred_b_ext = pred_b_ext.reshape(N, 2, -1)
    P = jnp.sum(pred_b * gt_b_ext, axis=2) / (jnp.sum(pred_b, axis=2) + 1e-7)
    R = jnp.sum(pred_b_ext * gt_b, axis=2) / (jnp.sum(gt_b, axis=2) + 1e-7)
    BF1 = 2 * P * R / (P + R + 1e-7)
    return jnp.mean(1.0 - BF1[:, 1])


if __name__ == "__main__":
    # BoundaryLoss has no learnable parameters (theta0=3, theta=5 hyperparams).
    key = jax.random.PRNGKey(0)
    k1, k2 = jax.random.split(key)
    N, H, W = 2, 16, 128
    # Narrow native dtypes: bf16 logits, int8 {0,1} mask (cast happens in-kernel).
    pred_logits = jax.random.normal(
        k1, (N, 1, H, W), dtype=jnp.float32).astype(jnp.bfloat16)
    gt_mask = (jax.random.uniform(k2, (N, H, W)) > 0.5).astype(jnp.int8)

    loss = boundary_loss(pred_logits, gt_mask, theta0=3, theta=5)
    jax.block_until_ready(loss)

    loss_ref = boundary_loss_ref(pred_logits, gt_mask, theta0=3, theta=5)
    np.testing.assert_allclose(np.asarray(loss), np.asarray(loss_ref),
                               rtol=1e-4, atol=1e-5)
    print("KERNEL_OK")
</pallas_src>

<mosaic_0001>
module attributes {stable_mosaic.version = 11 : i64} {
  func.func @_boundary_kernel(%arg0: i32, %arg1: memref<1x16x128xbf16, #tpu.memory_space<vmem>>, %arg2: memref<1x16x128xi8, #tpu.memory_space<vmem>>, %arg3: memref<1x1x4xf32, #tpu.memory_space<vmem>>) attributes {dimension_semantics = [#tpu.dimension_semantics<parallel>], iteration_bounds = array<i64: 2>, scalar_prefetch = 0 : i64, scratch_operands = 0 : i64, tpu.core_type = #tpu.core_type<tc>, window_params = [{transform_indices = @transform_0, window_bounds = array<i64: 1, 16, 128>}, {transform_indices = @transform_1, window_bounds = array<i64: 1, 16, 128>}, {transform_indices = @transform_2, window_bounds = array<i64: 1, 1, 4>}]} {
    %0 = tpu.iota {dimensions = array<i32: 0>} : vector<16x128xi32>
    %1 = tpu.iota {dimensions = array<i32: 1>} : vector<16x128xi32>
    %c0 = arith.constant 0 : index
    %c0_0 = arith.constant 0 : index
    %c0_1 = arith.constant 0 : index
    %2 = vector.load %arg1[%c0, %c0_0, %c0_1] : memref<1x16x128xbf16, #tpu.memory_space<vmem>>, vector<1x16x128xbf16>
    %3 = vector.shape_cast %2 : vector<1x16x128xbf16> to vector<16x128xbf16>
    %4 = arith.extf %3 : vector<16x128xbf16> to vector<16x128xf32>
    %5 = arith.negf %4 : vector<16x128xf32>
    %6 = math.exp %5 : vector<16x128xf32>
    %cst = arith.constant 1.000000e+00 : f32
    %7 = vector.broadcast %cst : f32 to vector<16x128xf32>
    %8 = arith.addf %7, %6 : vector<16x128xf32>
    %9 = arith.divf %7, %8 : vector<16x128xf32>
    %c0_2 = arith.constant 0 : index
    %c0_3 = arith.constant 0 : index
    %c0_4 = arith.constant 0 : index
    %10 = vector.load %arg2[%c0_2, %c0_3, %c0_4] : memref<1x16x128xi8, #tpu.memory_space<vmem>>, vector<1x16x128xi8>
    %11 = vector.shape_cast %10 : vector<1x16x128xi8> to vector<16x128xi8>
    %12 = arith.sitofp %11 : vector<16x128xi8> to vector<16x128xf32>
    %cst_5 = arith.constant 1.000000e+00 : f32
    %13 = vector.broadcast %cst_5 : f32 to vector<16x128xf32>
    %14 = arith.cmpf oeq, %12, %13 : vector<16x128xf32>
    %15 = arith.extui %14 : vector<16x128xi1> to vector<16x128xi32>
    %16 = arith.sitofp %15 : vector<16x128xi32> to vector<16x128xf32>
    %cst_6 = arith.constant 1.000000e+00 : f32
    %17 = vector.broadcast %cst_6 : f32 to vector<16x128xf32>
    %18 = arith.subf %17, %9 : vector<16x128xf32>
    %cst_7 = arith.constant 1.000000e+00 : f32
    %19 = vector.broadcast %cst_7 : f32 to vector<16x128xf32>
    %20 = arith.subf %19, %16 : vector<16x128xf32>
    %c15_i32 = arith.constant 15 : i32
    %21 = tpu.dynamic_rotate %20 by %c15_i32 dim 0 : vector<16x128xf32>, i32 -> vector<16x128xf32>
    %c15_i32_8 = arith.constant 15 : i32
    %22 = vector.broadcast %c15_i32_8 : i32 to vector<16x128xi32>
    %23 = arith.cmpi slt, %0, %22 : vector<16x128xi32>
    %cst_9 = arith.constant 0.000000e+00 : f32
    %24 = vector.broadcast %cst_9 : f32 to vector<16x128xf32>
    %25 = arith.select %23, %21, %24 : vector<16x128xi1>, vector<16x128xf32>
    %26 = arith.maximumf %20, %25 : vector<16x128xf32>
    %c1_i32 = arith.constant 1 : i32
    %27 = tpu.dynamic_rotate %20 by %c1_i32 dim 0 : vector<16x128xf32>, i32 -> vector<16x128xf32>
    %c1_i32_10 = arith.constant 1 : i32
    %28 = vector.broadcast %c1_i32_10 : i32 to vector<16x128xi32>
    %29 = arith.cmpi sge, %0, %28 : vector<16x128xi32>
    %cst_11 = arith.constant 0.000000e+00 : f32
    %30 = vector.broadcast %cst_11 : f32 to vector<16x128xf32>
    %31 = arith.select %29, %27, %30 : vector<16x128xi1>, vector<16x128xf32>
    %32 = arith.maximumf %26, %31 : vector<16x128xf32>
    %c127_i32 = arith.constant 127 : i32
    %33 = tpu.dynamic_rotate %32 by %c127_i32 dim 1 : vector<16x128xf32>, i32 -> vector<16x128xf32>
    %c127_i32_12 = arith.constant 127 : i32
    %34 = vector.broadcast %c127_i32_12 : i32 to vector<16x128xi32>
    %35 = arith.cmpi slt, %1, %34 : vector<16x128xi32>
    %cst_13 = arith.constant 0.000000e+00 : f32
    %36 = vector.broadcast %cst_13 : f32 to vector<16x128xf32>
    %37 = arith.select %35, %33, %36 : vector<16x128xi1>, vector<16x128xf32>
    %38 = arith.maximumf %32, %37 : vector<16x128xf32>
    %c1_i32_14 = arith.constant 1 : i32
    %39 = tpu.dynamic_rotate %32 by %c1_i32_14 dim 1 : vector<16x128xf32>, i32 -> vector<16x128xf32>
    %c1_i32_15 = arith.constant 1 : i32
    %40 = vector.broadcast %c1_i32_15 : i32 to vector<16x128xi32>
    %41 = arith.cmpi sge, %1, %40 : vector<16x128xi32>
    %cst_16 = arith.constant 0.000000e+00 : f32
    %42 = vector.broadcast %cst_16 : f32 to vector<16x128xf32>
    %43 = arith.select %41, %39, %42 : vector<16x128xi1>, vector<16x128xf32>
    %44 = arith.maximumf %38, %43 : vector<16x128xf32>
    %45 = arith.subf %44, %20 : vector<16x128xf32>
    %c15_i32_17 = arith.constant 15 : i32
    %46 = tpu.dynamic_rotate %18 by %c15_i32_17 dim 0 : vector<16x128xf32>, i32 -> vector<16x128xf32>
    %c15_i32_18 = arith.constant 15 : i32
    %47 = vector.broadcast %c15_i32_18 : i32 to vector<16x128xi32>
    %48 = arith.cmpi slt, %0, %47 : vector<16x128xi32>
    %cst_19 = arith.constant 0.000000e+00 : f32
    %49 = vector.broadcast %cst_19 : f32 to vector<16x128xf32>
    %50 = arith.select %48, %46, %49 : vector<16x128xi1>, vector<16x128xf32>
    %51 = arith.maximumf %18, %50 : vector<16x128xf32>
    %c1_i32_20 = arith.constant 1 : i32
    %52 = tpu.dynamic_rotate %18 by %c1_i32_20 dim 0 : vector<16x128xf32>, i32 -> vector<16x128xf32>
    %c1_i32_21 = arith.constant 1 : i32
    %53 = vector.broadcast %c1_i32_21 : i32 to vector<16x128xi32>
    %54 = arith.cmpi sge, %0, %53 : vector<16x128xi32>
    %cst_22 = arith.constant 0.000000e+00 : f32
    %55 = vector.broadcast %cst_22 : f32 to vector<16x128xf32>
    %56 = arith.select %54, %52, %55 : vector<16x128xi1>, vector<16x128xf32>
    %57 = arith.maximumf %51, %56 : vector<16x128xf32>
    %c127_i32_23 = arith.constant 127 : i32
    %58 = tpu.dynamic_rotate %57 by %c127_i32_23 dim 1 : vector<16x128xf32>, i32 -> vector<16x128xf32>
    %c127_i32_24 = arith.constant 127 : i32
    %59 = vector.broadcast %c127_i32_24 : i32 to vector<16x128xi32>
    %60 = arith.cmpi slt, %1, %59 : vector<16x128xi32>
    %cst_25 = arith.constant 0.000000e+00 : f32
    %61 = vector.broadcast %cst_25 : f32 to vector<16x128xf32>
    %62 = arith.select %60, %58, %61 : vector<16x128xi1>, vector<16x128xf32>
    %63 = arith.maximumf %57, %62 : vector<16x128xf32>
    %c1_i32_26 = arith.constant 1 : i32
    %64 = tpu.dynamic_rotate %57 by %c1_i32_26 dim 1 : vector<16x128xf32>, i32 -> vector<16x128xf32>
    %c1_i32_27 = arith.constant 1 : i32
    %65 = vector.broadcast %c1_i32_27 : i32 to vector<16x128xi32>
    %66 = arith.cmpi sge, %1, %65 : vector<16x128xi32>
    %cst_28 = arith.constant 0.000000e+00 : f32
    %67 = vector.broadcast %cst_28 : f32 to vector<16x128xf32>
    %68 = arith.select %66, %64, %67 : vector<16x128xi1>, vector<16x128xf32>
    %69 = arith.maximumf %63, %68 : vector<16x128xf32>
    %70 = arith.subf %69, %18 : vector<16x128xf32>
    %c15_i32_29 = arith.constant 15 : i32
    %71 = tpu.dynamic_rotate %45 by %c15_i32_29 dim 0 : vector<16x128xf32>, i32 -> vector<16x128xf32>
    %c15_i32_30 = arith.constant 15 : i32
    %72 = vector.broadcast %c15_i32_30 : i32 to vector<16x128xi32>
    %73 = arith.cmpi slt, %0, %72 : vector<16x128xi32>
    %cst_31 = arith.constant 0.000000e+00 : f32
    %74 = vector.broadcast %cst_31 : f32 to vector<16x128xf32>
    %75 = arith.select %73, %71, %74 : vector<16x128xi1>, vector<16x128xf32>
    %76 = arith.maximumf %45, %75 : vector<16x128xf32>
    %c1_i32_32 = arith.constant 1 : i32
    %77 = tpu.dynamic_rotate %45 by %c1_i32_32 dim 0 : vector<16x128xf32>, i32 -> vector<16x128xf32>
    %c1_i32_33 = arith.constant 1 : i32
    %78 = vector.broadcast %c1_i32_33 : i32 to vector<16x128xi32>
    %79 = arith.cmpi sge, %0, %78 : vector<16x128xi32>
    %cst_34 = arith.constant 0.000000e+00 : f32
    %80 = vector.broadcast %cst_34 : f32 to vector<16x128xf32>
    %81 = arith.select %79, %77, %80 : vector<16x128xi1>, vector<16x128xf32>
    %82 = arith.maximumf %76, %81 : vector<16x128xf32>
    %c14_i32 = arith.constant 14 : i32
    %83 = tpu.dynamic_rotate %45 by %c14_i32 dim 0 : vector<16x128xf32>, i32 -> vector<16x128xf32>
    %c14_i32_35 = arith.constant 14 : i32
    %84 = vector.broadcast %c14_i32_35 : i32 to vector<16x128xi32>
    %85 = arith.cmpi slt, %0, %84 : vector<16x128xi32>
    %cst_36 = arith.constant 0.000000e+00 : f32
    %86 = vector.broadcast %cst_36 : f32 to vector<16x128xf32>
    %87 = arith.select %85, %83, %86 : vector<16x128xi1>, vector<16x128xf32>
    %88 = arith.maximumf %82, %87 : vector<16x128xf32>
    %c2_i32 = arith.constant 2 : i32
    %89 = tpu.dynamic_rotate %45 by %c2_i32 dim 0 : vector<16x128xf32>, i32 -> vector<16x128xf32>
    %c2_i32_37 = arith.constant 2 : i32
    %90 = vector.broadcast %c2_i32_37 : i32 to vector<16x128xi32>
    %91 = arith.cmpi sge, %0, %90 : vector<16x128xi32>
    %cst_38 = arith.constant 0.000000e+00 : f32
    %92 = vector.broadcast %cst_38 : f32 to vector<16x128xf32>
    %93 = arith.select %91, %89, %92 : vector<16x128xi1>, vector<16x128xf32>
    %94 = arith.maximumf %88, %93 : vector<16x128xf32>
    %c127_i32_39 = arith.constant 127 : i32
    %95 = tpu.dynamic_rotate %94 by %c127_i32_39 dim 1 : vector<16x128xf32>, i32 -> vector<16x128xf32>
    %c127_i32_40 = arith.constant 127 : i32
    %96 = vector.broadcast %c127_i32_40 : i32 to vector<16x128xi32>
    %97 = arith.cmpi slt, %1, %96 : vector<16x128xi32>
    %cst_41 = arith.constant 0.000000e+00 : f32
    %98 = vector.broadcast %cst_41 : f32 to vector<16x128xf32>
    %99 = arith.select %97, %95, %98 : vector<16x128xi1>, vector<16x128xf32>
    %100 = arith.maximumf %94, %99 : vector<16x128xf32>
    %c1_i32_42 = arith.constant 1 : i32
    %101 = tpu.dynamic_rotate %94 by %c1_i32_42 dim 1 : vector<16x128xf32>, i32 -> vector<16x128xf32>
    %c1_i32_43 = arith.constant 1 : i32
    %102 = vector.broadcast %c1_i32_43 : i32 to vector<16x128xi32>
    %103 = arith.cmpi sge, %1, %102 : vector<16x128xi32>
    %cst_44 = arith.constant 0.000000e+00 : f32
    %104 = vector.broadcast %cst_44 : f32 to vector<16x128xf32>
    %105 = arith.select %103, %101, %104 : vector<16x128xi1>, vector<16x128xf32>
    %106 = arith.maximumf %100, %105 : vector<16x128xf32>
    %c126_i32 = arith.constant 126 : i32
    %107 = tpu.dynamic_rotate %94 by %c126_i32 dim 1 : vector<16x128xf32>, i32 -> vector<16x128xf32>
    %c126_i32_45 = arith.constant 126 : i32
    %108 = vector.broadcast %c126_i32_45 : i32 to vector<16x128xi32>
    %109 = arith.cmpi slt, %1, %108 : vector<16x128xi32>
    %cst_46 = arith.constant 0.000000e+00 : f32
    %110 = vector.broadcast %cst_46 : f32 to vector<16x128xf32>
    %111 = arith.select %109, %107, %110 : vector<16x128xi1>, vector<16x128xf32>
    %112 = arith.maximumf %106, %111 : vector<16x128xf32>
    %c2_i32_47 = arith.constant 2 : i32
    %113 = tpu.dynamic_rotate %94 by %c2_i32_47 dim 1 : vector<16x128xf32>, i32 -> vector<16x128xf32>
    %c2_i32_48 = arith.constant 2 : i32
    %114 = vector.broadcast %c2_i32_48 : i32 to vector<16x128xi32>
    %115 = arith.cmpi sge, %1, %114 : vector<16x128xi32>
    %cst_49 = arith.constant 0.000000e+00 : f32
    %116 = vector.broadcast %cst_49 : f32 to vector<16x128xf32>
    %117 = arith.select %115, %113, %116 : vector<16x128xi1>, vector<16x128xf32>
    %118 = arith.maximumf %112, %117 : vector<16x128xf32>
    %c15_i32_50 = arith.constant 15 : i32
    %119 = tpu.dynamic_rotate %70 by %c15_i32_50 dim 0 : vector<16x128xf32>, i32 -> vector<16x128xf32>
    %c15_i32_51 = arith.constant 15 : i32
    %120 = vector.broadcast %c15_i32_51 : i32 to vector<16x128xi32>
    %121 = arith.cmpi slt, %0, %120 : vector<16x128xi32>
    %cst_52 = arith.constant 0.000000e+00 : f32
    %122 = vector.broadcast %cst_52 : f32 to vector<16x128xf32>
    %123 = arith.select %121, %119, %122 : vector<16x128xi1>, vector<16x128xf32>
    %124 = arith.maximumf %70, %123 : vector<16x128xf32>
    %c1_i32_53 = arith.constant 1 : i32
    %125 = tpu.dynamic_rotate %70 by %c1_i32_53 dim 0 : vector<16x128xf32>, i32 -> vector<16x128xf32>
    %c1_i32_54 = arith.constant 1 : i32
    %126 = vector.broadcast %c1_i32_54 : i32 to vector<16x128xi32>
    %127 = arith.cmpi sge, %0, %126 : vector<16x128xi32>
    %cst_55 = arith.constant 0.000000e+00 : f32
    %128 = vector.broadcast %cst_55 : f32 to vector<16x128xf32>
    %129 = arith.select %127, %125, %128 : vector<16x128xi1>, vector<16x128xf32>
    %130 = arith.maximumf %124, %129 : vector<16x128xf32>
    %c14_i32_56 = arith.constant 14 : i32
    %131 = tpu.dynamic_rotate %70 by %c14_i32_56 dim 0 : vector<16x128xf32>, i32 -> vector<16x128xf32>
    %c14_i32_57 = arith.constant 14 : i32
    %132 = vector.broadcast %c14_i32_57 : i32 to vector<16x128xi32>
    %133 = arith.cmpi slt, %0, %132 : vector<16x128xi32>
    %cst_58 = arith.constant 0.000000e+00 : f32
    %134 = vector.broadcast %cst_58 : f32 to vector<16x128xf32>
    %135 = arith.select %133, %131, %134 : vector<16x128xi1>, vector<16x128xf32>
    %136 = arith.maximumf %130, %135 : vector<16x128xf32>
    %c2_i32_59 = arith.constant 2 : i32
    %137 = tpu.dynamic_rotate %70 by %c2_i32_59 dim 0 : vector<16x128xf32>, i32 -> vector<16x128xf32>
    %c2_i32_60 = arith.constant 2 : i32
    %138 = vector.broadcast %c2_i32_60 : i32 to vector<16x128xi32>
    %139 = arith.cmpi sge, %0, %138 : vector<16x128xi32>
    %cst_61 = arith.constant 0.000000e+00 : f32
    %140 = vector.broadcast %cst_61 : f32 to vector<16x128xf32>
    %141 = arith.select %139, %137, %140 : vector<16x128xi1>, vector<16x128xf32>
    %142 = arith.maximumf %136, %141 : vector<16x128xf32>
    %c127_i32_62 = arith.constant 127 : i32
    %143 = tpu.dynamic_rotate %142 by %c127_i32_62 dim 1 : vector<16x128xf32>, i32 -> vector<16x128xf32>
    %c127_i32_63 = arith.constant 127 : i32
    %144 = vector.broadcast %c127_i32_63 : i32 to vector<16x128xi32>
    %145 = arith.cmpi slt, %1, %144 : vector<16x128xi32>
    %cst_64 = arith.constant 0.000000e+00 : f32
    %146 = vector.broadcast %cst_64 : f32 to vector<16x128xf32>
    %147 = arith.select %145, %143, %146 : vector<16x128xi1>, vector<16x128xf32>
    %148 = arith.maximumf %142, %147 : vector<16x128xf32>
    %c1_i32_65 = arith.constant 1 : i32
    %149 = tpu.dynamic_rotate %142 by %c1_i32_65 dim 1 : vector<16x128xf32>, i32 -> vector<16x128xf32>
    %c1_i32_66 = arith.constant 1 : i32
    %150 = vector.broadcast %c1_i32_66 : i32 to vector<16x128xi32>
    %151 = arith.cmpi sge, %1, %150 : vector<16x128xi32>
    %cst_67 = arith.constant 0.000000e+00 : f32
    %152 = vector.broadcast %cst_67 : f32 to vector<16x128xf32>
    %153 = arith.select %151, %149, %152 : vector<16x128xi1>, vector<16x128xf32>
    %154 = arith.maximumf %148, %153 : vector<16x128xf32>
    %c126_i32_68 = arith.constant 126 : i32
    %155 = tpu.dynamic_rotate %142 by %c126_i32_68 dim 1 : vector<16x128xf32>, i32 -> vector<16x128xf32>
    %c126_i32_69 = arith.constant 126 : i32
    %156 = vector.broadcast %c126_i32_69 : i32 to vector<16x128xi32>
    %157 = arith.cmpi slt, %1, %156 : vector<16x128xi32>
    %cst_70 = arith.constant 0.000000e+00 : f32
    %158 = vector.broadcast %cst_70 : f32 to vector<16x128xf32>
    %159 = arith.select %157, %155, %158 : vector<16x128xi1>, vector<16x128xf32>
    %160 = arith.maximumf %154, %159 : vector<16x128xf32>
    %c2_i32_71 = arith.constant 2 : i32
    %161 = tpu.dynamic_rotate %142 by %c2_i32_71 dim 1 : vector<16x128xf32>, i32 -> vector<16x128xf32>
    %c2_i32_72 = arith.constant 2 : i32
    %162 = vector.broadcast %c2_i32_72 : i32 to vector<16x128xi32>
    %163 = arith.cmpi sge, %1, %162 : vector<16x128xi32>
    %cst_73 = arith.constant 0.000000e+00 : f32
    %164 = vector.broadcast %cst_73 : f32 to vector<16x128xf32>
    %165 = arith.select %163, %161, %164 : vector<16x128xi1>, vector<16x128xf32>
    %166 = arith.maximumf %160, %165 : vector<16x128xf32>
    %167 = arith.mulf %70, %118 : vector<16x128xf32>
    %cst_74 = arith.constant dense<0.000000e+00> : vector<128xf32>
    %168 = vector.multi_reduction <add>, %167, %cst_74 [0] : vector<16x128xf32> to vector<128xf32>
    %169 = vector.shape_cast %168 : vector<128xf32> to vector<1x128xf32>
    %cst_75 = arith.constant dense<0.000000e+00> : vector<1xf32>
    %170 = vector.multi_reduction <add>, %169, %cst_75 [1] : vector<1x128xf32> to vector<1xf32>
    %171 = vector.shape_cast %170 : vector<1xf32> to vector<1x1xf32>
    %cst_76 = arith.constant dense<0.000000e+00> : vector<128xf32>
    %172 = vector.multi_reduction <add>, %70, %cst_76 [0] : vector<16x128xf32> to vector<128xf32>
    %173 = vector.shape_cast %172 : vector<128xf32> to vector<1x128xf32>
    %cst_77 = arith.constant dense<0.000000e+00> : vector<1xf32>
    %174 = vector.multi_reduction <add>, %173, %cst_77 [1] : vector<1x128xf32> to vector<1xf32>
    %175 = vector.shape_cast %174 : vector<1xf32> to vector<1x1xf32>
    %176 = arith.mulf %166, %45 : vector<16x128xf32>
    %cst_78 = arith.constant dense<0.000000e+00> : vector<128xf32>
    %177 = vector.multi_reduction <add>, %176, %cst_78 [0] : vector<16x128xf32> to vector<128xf32>
    %178 = vector.shape_cast %177 : vector<128xf32> to vector<1x128xf32>
    %cst_79 = arith.constant dense<0.000000e+00> : vector<1xf32>
    %179 = vector.multi_reduction <add>, %178, %cst_79 [1] : vector<1x128xf32> to vector<1xf32>
    %180 = vector.shape_cast %179 : vector<1xf32> to vector<1x1xf32>
    %cst_80 = arith.constant dense<0.000000e+00> : vector<128xf32>
    %181 = vector.multi_reduction <add>, %45, %cst_80 [0] : vector<16x128xf32> to vector<128xf32>
    %182 = vector.shape_cast %181 : vector<128xf32> to vector<1x128xf32>
    %cst_81 = arith.constant dense<0.000000e+00> : vector<1xf32>
    %183 = vector.multi_reduction <add>, %182, %cst_81 [1] : vector<1x128xf32> to vector<1xf32>
    %184 = vector.shape_cast %183 : vector<1xf32> to vector<1x1xf32>
    %185 = tpu.concatenate %171, %175, %180, %184 in 1 : vector<1x1xf32>, vector<1x1xf32>, vector<1x1xf32>, vector<1x1xf32> -> vector<1x4xf32>
    %c0_82 = arith.constant 0 : index
    %c0_83 = arith.constant 0 : index
    %c0_84 = arith.constant 0 : index
    %186 = vector.load %arg3[%c0_82, %c0_83, %c0_84] : memref<1x1x4xf32, #tpu.memory_space<vmem>>, vector<1x1x4xf32>
    %187 = vector.shape_cast %186 : vector<1x1x4xf32> to vector<1x4xf32>
    %188 = vector.shape_cast %185 : vector<1x4xf32> to vector<1x1x4xf32>
    tpu.vector_store %arg3[%c0_82, %c0_83, %c0_84], %188 {strides = array<i32>} : memref<1x1x4xf32, #tpu.memory_space<vmem>>, vector<1x1x4xf32>,
    return
  }
  func.func @transform_0(%arg0: i32) -> (i32, i32, i32) {
    %c0_i32 = arith.constant 0 : i32
    %c0_i32_0 = arith.constant 0 : i32
    %c0_i32_1 = arith.constant 0 : i32
    return %arg0, %c0_i32, %c0_i32_0 : i32, i32, i32
  }
  func.func @transform_1(%arg0: i32) -> (i32, i32, i32) {
    %c0_i32 = arith.constant 0 : i32
    %c0_i32_0 = arith.constant 0 : i32
    %c0_i32_1 = arith.constant 0 : i32
    return %arg0, %c0_i32, %c0_i32_0 : i32, i32, i32
  }
  func.func @transform_2(%arg0: i32) -> (i32, i32, i32) {
    %c0_i32 = arith.constant 0 : i32
    %c0_i32_0 = arith.constant 0 : i32
    %c0_i32_1 = arith.constant 0 : i32
    return %arg0, %c0_i32, %c0_i32_0 : i32, i32, i32
  }
}

</mosaic_0001>

<bundles_post_ra>
// kernel: tpu_custom_call.1
= control target key start
LH: loop header
LB: loop body
LE: loop exit
PB: predicated region body
PF: predicated region fallthrough
CT: control target
= control target key end

     0   :  { %7 = vsyncpa [#allocation3], 0  ;;  %s1315_s0 = inlined_call_operand.hbm [shape: bf16[2,16,128], index: 0, kind: input, shape index: {}]   ;;  %s1316_s1 = inlined_call_operand.hbm [shape: s8[2,16,128], index: 1, kind: input, shape index: {}]   ;;  %s1317_s2 = inlined_call_operand.hbm [shape: f32[2,1,4], index: 2, kind: output, shape index: {}]  }
   0x1   :  { %9 = vsyncpa [#allocation3 + $0x1], 0 }
   0x2   :  { %10 = vsyncpa [#allocation6], 0 }
   0x3   :  { %12 = vsyncpa [#allocation6 + $0x1], 0 }
   0x4   :  { %13 = vsyncpa [#allocation4], 0 }
   0x5   :  { %15 = vsyncpa [#allocation4 + $0x1], 0  ;;  %s850_s9 = smov 0   ;;  %s852_s10 = smov 0  }
   0x6   :  { %s854_s11 = smov 0   ;;  %s856_s12 = smov 0  }
   0x7 LB: > { %s871_s13 = sadd.s32 4294967295, %s821_s12   ;;  %s600_s14 = sadd.s32 4294967294, %s821_s12   ;;  %s821_s12 = sphi %s856_s12, %s1333_s12   ;;  %s817_s11 = sphi %s854_s11, %s1332_s11   ;;  %s813_s10 = sphi %s852_s10, %s1331_s10   ;;  %s809_s9 = sphi %s850_s9, %s1330_s9  }
   0x8   : > { %s875_s15 = sadd.s32 1, %s821_s12   ;;  %s28_s16 = sadd.s32 1, %s817_s11 }
   0x9   : > { %s25_s17 = ssub.s32 %s821_s12, %s875_s15  ;;  %p35_p0 = scmp.ne.s32.totalorder %s817_s11, %s813_s10 }
   0xa   : > { %p26_p1 = scmp.eq.s32.totalorder %s25_s17, 0  ;;  %p36_p2 = scmp.eq.s32.totalorder %s821_s12, 0 }
   0xb   : > { %p41_p3 = scmp.ne.s32.totalorder %s813_s10, %s809_s9  ;;  %p42_p4 = scmp.eq.s32.totalorder %s871_s13, 0 }
   0xc   : > { %s887_s18 = scalar_select %p26_p1, %s817_s11, %s28_s16  }
   0xd   : > { %p889_p5 = por %p36_p2, %p35_p0  ;;  %p893_p6 = por %p42_p4, %p41_p3 }
   0xe   : > { %p91_p7 = scmp.eq.s32.totalorder %s871_s13, 1  ;;  %p97_p8 = scmp.eq.s32.totalorder %s600_s14, 1 }
   0xf   : > { %s1321_s20 = scalar_select %p893_p6, 1, 0 }
  0x10   : > { %p646_p10 = scmp.lt.s32.totalorder %s821_s12, 2  ;;  %p900_p11 = por %p91_p7, %p35_p0 }
  0x11   : > { %p904_p12 = por %p97_p8, %p41_p3  ;;  %s909_s23 = sand.u32 1, %s817_s11  }
  0x12   : > { %s1322_s21 = scalar_select %p900_p11, 1, 0 }
  0x13   : > { %s1323_s22 = scalar_select %p904_p12, 1, 0 }
  0x14   : > { %s619_s24 = sshll.u32 %s821_s12, 7  ;;  %s603_s25 = sshll.u32 %s909_s23, 3 }
  0x15   : > { %s916_s28 = scalar_lea.hbm %s1315_s0, %s619_s24  ;;  %s121_s29 = scalar_lea.vmem [#allocation2], %s603_s25 }
  0x16   : > { %s128_s30 = sshll.u32 %s121_s29, 4  ;;  %p920_p13 = pnand %p646_p10, %p889_p5  ;;  %s924_s30 = int_to_ptr.vmem [resolvable:$true] %s128_s30 }
  0x17   : > { %s118_s4 = scalar_lea.sflag [#allocation3], %s909_s23  ;;  %s697_s5 = scalar_lea.hbm %s916_s28, 128 }
  0x18   : > { %p698_p0 = scmp.ne.s32.totalorder %s916_s28, %s697_s5  ;;  %p699_p1 = pneg %p920_p13 }
  0x19   : > { %s702_s8 = scalar_lea.hbm %s1315_s0, 256  ;;  %p703_p4 = scmp.lt.s32.totalorder %s916_s28, %s1315_s0 }
  0x1a   : > { %p700_p2 = pnand %p699_p1, %p698_p0  ;;  %p704_p5 = scmp.lt.s32.totalorder %s702_s8, %s697_s5 }
  0x1c   : > { %p701_p3 = pneg %p700_p2  ;;  %p705_p7 = por %p704_p5, %p703_p4 }
  0x1e   : > { %p706_p8 = pnand %p705_p7, %p701_p3 }
  0x20   : > { %709 = shalt.err (!%p706_p8)
}
  0x21   : > { %s710_s17 = scalar_lea.vmem %s924_s30, 128  ;;  %s823_s19 = smov [#allocation2]  }
  0x22   : > { %p711_p10 = scmp.ne.s32.totalorder %s924_s30, %s710_s17  ;;  %s715_s24 = sshll.u32 %s823_s19, 4  ;;  %s716_s24 = int_to_ptr.vmem [resolvable:$false] %s715_s24 }
  0x23   : > { %s717_s25 = scalar_lea.vmem %s716_s24, 256  ;;  %p718_p9 = scmp.lt.s32.totalorder %s924_s30, %s716_s24 }
  0x24   : > { %p713_p0 = pnand %p711_p10, %p699_p1  ;;  %p719_p12 = scmp.lt.s32.totalorder %s717_s25, %s710_s17 }
  0x26   : > { %p714_p2 = pneg %p713_p0  ;;  %p720_p11 = por %p719_p12, %p718_p9 }
  0x28   : > { %p721_p4 = pnand %p720_p11, %p714_p2 }
  0x2a   : > { %724 = shalt.err (!%p721_p4)
}
  0x2b   : > { %s824_s26 = smov 64   ;;  %s825_s27 = smov 4  }
  0x2c   : > { %638 = dma.hbm_to_vmem [thread:$0]  (!%p920_p13), %s916_s28, 128, %s924_s30, %s118_s4, %s824_s26, %s824_s26, %s825_s27  }
  0x2d   : > { %p609_p3 = scmp.ge.s32.totalorder %s821_s12, 1  ;;  %p157_p5 = scmp.lt.s32.totalorder %s821_s12, 3 }
  0x2e   : > { %s606_s29 = sshll.u32 %s909_s23, 2  ;;  %s620_s6 = sshll.u32 %s821_s12, 6 }
  0x2f   : > { %p956_p9 = pnand %p609_p3, %p157_p5  ;;  %s142_s7 = scalar_lea.vmem [#allocation5], %s606_s29 }
  0x30   : > { %s149_s8 = sshll.u32 %s142_s7, 4  ;;  %s964_s17 = scalar_lea.hbm %s1316_s1, %s620_s6  ;;  %s966_s8 = int_to_ptr.vmem [resolvable:$true] %s149_s8 }
  0x31   : > { %s139_s28 = scalar_lea.sflag [#allocation6], %s909_s23  ;;  %s725_s30 = scalar_lea.hbm %s964_s17, 64 }
  0x32   : > { %p726_p11 = scmp.ne.s32.totalorder %s964_s17, %s725_s30  ;;  %s730_s24 = scalar_lea.hbm %s1316_s1, 128 }
  0x33   : > { %p731_p8 = scmp.lt.s32.totalorder %s964_s17, %s1316_s1  ;;  %p732_p10 = scmp.lt.s32.totalorder %s730_s24, %s725_s30 }
  0x34   : > { %p728_p12 = pnand %p726_p11, %p699_p1 }
  0x35   : > { %p733_p0 = por %p732_p10, %p731_p8 }
  0x36   : > { %p729_p7 = pneg %p728_p12 }
  0x38   : > { %p734_p2 = pnand %p733_p0, %p729_p7 }
  0x3a   : > { %737 = shalt.err (!%p734_p2)
}
  0x3b   : > { %s738_s27 = scalar_lea.vmem %s966_s8, 64  ;;  %s826_s29 = smov [#allocation5]  }
  0x3c   : > { %p739_p4 = scmp.ne.s32.totalorder %s966_s8, %s738_s27  ;;  %s743_s6 = sshll.u32 %s826_s29, 4  ;;  %s744_s6 = int_to_ptr.vmem [resolvable:$false] %s743_s6 }
  0x3d   : > { %s745_s7 = scalar_lea.vmem %s744_s6, 128  ;;  %p746_p11 = scmp.lt.s32.totalorder %s966_s8, %s744_s6 }
  0x3e   : > { %p741_p3 = pnand %p739_p4, %p699_p1  ;;  %p747_p12 = scmp.lt.s32.totalorder %s745_s7, %s738_s27 }
  0x40   : > { %p742_p5 = pneg %p741_p3  ;;  %p748_p6 = por %p747_p12, %p746_p11 }
  0x42   : > { %p749_p8 = pnand %p748_p6, %p742_p5 }
  0x44   : > { %752 = shalt.err (!%p749_p8)
}
  0x45   : > { %s827_s14 = smov 32   ;;  %s828_s16 = smov 2  }
  0x46   : > { %641 = dma.hbm_to_vmem [thread:$0]  (!%p920_p13), %s964_s17, 64, %s966_s8, %s139_s28, %s827_s14, %s827_s14, %s828_s16  }
  0x47   : > { %161 = sbr.rel (%p956_p9) target bundleno = 567 (0x237), region = 28  ;;  %s996_s30 = sand.u32 (!%p956_p9), 1, %s813_s10  }
  0x48   : > { %s610_s4 = sshll.u32 (!%p956_p9), %s996_s30, 3  ;;  %s164_s19 = scalar_lea.sflag (!%p956_p9), [#allocation3], %s996_s30 }
  0x49   : > { %s167_s24 = scalar_lea.vmem (!%p956_p9), [#allocation2], %s610_s4  ;;  %p1326_p6 = scmp.ne.s32.totalorder (!%p956_p9), %s1321_s20, 0 }
  0x4c   : > { %796 = dma.done.wait (%p1326_p6), %s164_s19, 128  }
  0x4d   : > { %798 = vsyncadd (%p1326_p6), %s164_s19, 4294967168  ;;  %s611_s23 = sshll.u32 %s996_s30, 2  ;;  %s173_s3 = scalar_lea.sflag [#allocation6], %s996_s30 }
  0x4e   : > { %s176_s5 = scalar_lea.vmem [#allocation5], %s611_s23 }
  0x4f   : > { %800 = dma.done.wait (%p1326_p6), %s173_s3, 64  }
  0x50   : > { %802 = vsyncadd (%p1326_p6), %s173_s3, 4294967232  ;;  %v201_v0 = vlaneseq  ;;  %v626_v1 = vld [vmem:[%s176_s5] sm:$0xf]   ;;  %v622_v2 = vld [vmem:[%s167_s24] sm:$0xff]   ;;  %v829_v13 = vmov 0.0   ;;  %s830_s20 = smov 127  }
  0x51   : > { %v627_v3 = vunpack.c.0.s8 %v626_v1  ;;  %v628_v4 = vunpack.c.1.s8 %v626_v1  ;;  %v623_v5 = vunpack.c.l.bf16 %v622_v2  ;;  %v624_v6 = vunpack.c.h.bf16 %v622_v2  ;;  %s831_s8 = smov 1   ;;  %s832_s17 = smov 126  }
  0x52   : > { %v1011_v7 = vshrl.u32 %v201_v0, 7  ;;  %v1081_v54 = vand.u32 127, %v201_v0  ;;  %s833_s28 = smov 2   ;;  %vm490_vm14 = vcmask 7168   ;;  %vm492_vm15 = vcmask 15360   ;;  %s616_s25 = sshll.u32 %s871_s13, 4 }
  0x53   : > { %v226_v8 = vcvt.s32.f32 %v627_v3  ;;  %v227_v9 = vcvt.s32.f32 %v628_v4  ;;  %v612_v10 = vmul.f32 -1.442695, %v623_v5  ;;  %v613_v11 = vmul.f32 -1.442695, %v624_v6  ;;  %s200_s26 = scalar_lea.vmem [#allocation7], %s996_s30  ;;  %s1278_s7 = scalar_lea.hbm %s1317_s2, %s616_s25 }
  0x54   : > { %v1014_v12 = vadd.s32 8, %v1011_v7  ;;  %vm240_vm2 = vcmp.lt.s32.totalorder %v1011_v7, 7  ;;  %vm251_vm3 = vcmp.lt.s32.totalorder %v1011_v7, 1  ;;  %vm254_vm4 = vcmp.ge.s32.totalorder %v1011_v7, 1  ;;  %s511_s27 = sshll.u32 %s200_s26, 4  ;;  %s499_s14 = scalar_lea.sflag [#allocation4], %s996_s30  ;;  %s512_s27 = int_to_ptr.vmem [resolvable:$true] %s511_s27 }
  0x55   : > { %vm228_vm0 = vcmp.eq.f32.partialorder %v226_v8, 1.0  ;;  %vm229_vm1 = vcmp.eq.f32.partialorder %v227_v9, 1.0  ;;  %689 = vpow2.f32 %v612_v10  ;;  %vm264_vm6 = vcmp.lt.s32.totalorder %v1081_v54, 127  ;;  %s753_s16 = scalar_lea.vmem %s512_s27, 16  ;;  %p1327_p1 = scmp.ne.s32.totalorder %s1322_s21, 0 }
  0x56   : > { %v614_v14 = vsel %vm228_vm0, 1.0, %v829_v13  ;;  %v615_v15 = vsel %vm229_vm1, 1.0, %v829_v13  ;;  %691 = vpow2.f32 %v613_v11  ;;  %vm244_vm5 = vcmp.lt.s32.totalorder %v1014_v12, 15  ;;  %p754_p13 = scmp.ne.s32.totalorder %s512_s27, %s753_s16  ;;  %s834_s13 = smov [#allocation7]  }
  0x57   : > { %v1016_v16 = vsub.f32 1.0, %v614_v14  ;;  %v1018_v17 = vsub.f32 1.0, %v615_v15  ;;  %vm273_vm7 = vcmp.ge.s32.totalorder %v1081_v54, 1  ;;  %vm332_vm8 = vcmp.lt.s32.totalorder %v1011_v7, 6  ;;  %s757_s4 = sshll.u32 %s834_s13, 4  ;;  %s758_s4 = int_to_ptr.vmem [resolvable:$false] %s757_s4 }
  0x58   : > { %vm336_vm9 = vcmp.lt.s32.totalorder %v1014_v12, 14  ;;  %vm343_vm10 = vcmp.lt.s32.totalorder %v1011_v7, 2  ;;  %vm346_vm11 = vcmp.ge.s32.totalorder %v1011_v7, 2  ;;  %vm372_vm12 = vcmp.lt.s32.totalorder %v1081_v54, 126  ;;  %p755_p9 = pnand %p754_p13, %p1327_p1  ;;  %s759_s19 = scalar_lea.vmem %s758_s4, 32 }
  0x59   : > { %v238_v18 = vrot.slane %v1016_v16, 1  ;;  %v239_v19 = vrot.slane %v1018_v17, 1  ;;  %v249_v20 = vrot.slane %v1016_v16, 7  ;;  %v250_v21 = vrot.slane %v1018_v17, 7  ;;  %p760_p10 = scmp.lt.s32.totalorder %s512_s27, %s758_s4  ;;  %p761_p0 = scmp.lt.s32.totalorder %s759_s19, %s753_s16 }
  0x5a   : > { %vm381_vm13 = vcmp.ge.s32.totalorder %v1081_v54, 2  ;;  %vm494_vm0 = vcmask 23552   ;;  %vm496_vm1 = vcmask 24576   ;;  %p756_p7 = pneg %p755_p9 }
  0x5b   : > { %v241_v22 = vsel %vm240_vm2, %v238_v18, %v239_v19  ;;  %v253_v23 = vsel %vm251_vm3, %v250_v21, %v249_v20  ;;  %v242_v24 = vsel %vm240_vm2, %v239_v19, %v238_v18  ;;  %v252_v28 = vsel %vm251_vm3, %v249_v20, %v250_v21  ;;  %p762_p2 = por %p761_p0, %p760_p10 }
  0x5c   : > { %v247_v25 = vmax.f32 %v1016_v16, %v241_v22  ;;  %v256_v26 = vsel %vm254_vm4, %v253_v23, 0.0  ;;  %v246_v27 = vsel %vm244_vm5, %v242_v24, 0.0 }
  0x5d   : > { %v248_v29 = vmax.f32 %v1018_v17, %v246_v27  ;;  %p763_p4 = pnand %p762_p2, %p756_p7 }
  0x5e   : > { %v258_v30 = vmax.f32 %v247_v25, %v256_v26 }
  0x5f   : > { %v259_v31 = vmax.f32 %v248_v29, %v252_v28 }
  0x60   : > { %260 = vrot.lane.b32.xlu0 %v258_v30, %s830_s20 }
  0x61   : > { %271 = vrot.lane.b32.xlu1 %v259_v31, %s831_s8 }
  0x62   : > { %v690_v32 = vpop.eup %689 }
  0x63   : > { %v692_v33 = vpop.eup %691  ;;  %v216_v34 = vadd.f32 1.0, %v690_v32 }
  0x64   : > { %269 = vrot.lane.b32.xlu0 %v258_v30, %s831_s8  ;;  %v217_v35 = vadd.f32 1.0, %v692_v33 }
  0x65   : > { %693 = vrcp.f32 %v216_v34 }
  0x66   : > { %695 = vrcp.f32 %v217_v35 }
  0x68   : > { %262 = vrot.lane.b32.xlu0 %v259_v31, %s830_s20 }
  0x72   : > { %v694_v36 = vpop.eup %693 }
  0x73   : > { %v696_v37 = vpop.eup %695  ;;  %v1046_v38 = vsub.f32 1.0, %v694_v36 }
  0x74   : > { %v1048_v39 = vsub.f32 1.0, %v696_v37 }
  0x75   : > { %v280_v40 = vrot.slane %v1046_v38, 1  ;;  %v288_v41 = vrot.slane %v1046_v38, 7 }
  0x76   : > { %v281_v42 = vrot.slane %v1048_v39, 1  ;;  %v289_v43 = vrot.slane %v1048_v39, 7 }
  0x78   : > { %v282_v44 = vsel %vm240_vm2, %v280_v40, %v281_v42  ;;  %v291_v45 = vsel %vm251_vm3, %v289_v43, %v288_v41  ;;  %v283_v46 = vsel %vm240_vm2, %v281_v42, %v280_v40  ;;  %v290_v51 = vsel %vm251_vm3, %v288_v41, %v289_v43 }
  0x79   : > { %v286_v47 = vmax.f32 %v1046_v38, %v282_v44  ;;  %v292_v48 = vsel %vm254_vm4, %v291_v45, 0.0  ;;  %v285_v49 = vsel %vm244_vm5, %v283_v46, 0.0 }
  0x7a   : > { %v287_v50 = vmax.f32 %v1048_v39, %v285_v49 }
  0x7b   : > { %v1068_v52 = vmax.f32 %v286_v47, %v292_v48 }
  0x7c   : > { %v1074_v53 = vmax.f32 %v287_v50, %v290_v51 }
  0x7d   : > { %296 = vrot.lane.b32.xlu1 %v1068_v52, %s830_s20  ;;  %304 = vrot.lane.b32.xlu0 %v1068_v52, %s831_s8 }
  0x81   : > { %298 = vrot.lane.b32.xlu1 %v1074_v53, %s830_s20 }
  0x85   : > { %306 = vrot.lane.b32.xlu1 %v1074_v53, %s831_s8 }
  0xd2   : > { %v261_v55 = vpop.permute.xlu0 %260 }
  0xd3   : > { %v265_v56 = vsel %vm264_vm6, %v261_v55, 0.0  ;;  %v272_v61 = vpop.permute.xlu1 %271 }
  0xd4   : > { %v267_v57 = vmax.f32 %v258_v30, %v265_v56  ;;  %v275_v0 = vsel %vm273_vm7, %v272_v61, 0.0 }
  0xd6   : > { %v270_v58 = vpop.permute.xlu0 %269 }
  0xd7   : > { %v274_v59 = vsel %vm273_vm7, %v270_v58, 0.0 }
  0xd8   : > { %v276_v60 = vmax.f32 %v267_v57, %v274_v59 }
  0xda   : > { %v263_v62 = vpop.permute.xlu0 %262  ;;  %v1094_v1 = vsub.f32 %v276_v60, %v1016_v16 }
  0xdb   : > { %v266_v63 = vsel %vm264_vm6, %v263_v62, 0.0 }
  0xdc   : > { %v268_v2 = vmax.f32 %v259_v31, %v266_v63  ;;  %v314_v5 = vrot.slane %v1094_v1, 1  ;;  %v322_v6 = vrot.slane %v1094_v1, 7  ;;  %v330_v10 = vrot.slane %v1094_v1, 2 }
  0xdd   : > { %v341_v13 = vrot.slane %v1094_v1, 6 }
  0xde   : > { %v277_v3 = vmax.f32 %v268_v2, %v275_v0 }
  0xe0   : > { %v1097_v4 = vsub.f32 %v277_v3, %v1018_v17 }
  0xe2   : > { %v315_v8 = vrot.slane %v1097_v4, 1  ;;  %v323_v9 = vrot.slane %v1097_v4, 7  ;;  %v331_v11 = vrot.slane %v1097_v4, 2  ;;  %v342_v14 = vrot.slane %v1097_v4, 6 }
  0xe4   : > { %v316_v15 = vsel %vm240_vm2, %v314_v5, %v315_v8  ;;  %v325_v16 = vsel %vm251_vm3, %v323_v9, %v322_v6  ;;  %v317_v19 = vsel %vm240_vm2, %v315_v8, %v314_v5  ;;  %v324_v21 = vsel %vm251_vm3, %v322_v6, %v323_v9 }
  0xe5   : > { %v320_v17 = vmax.f32 %v1094_v1, %v316_v15  ;;  %v326_v18 = vsel %vm254_vm4, %v325_v16, 0.0  ;;  %v319_v20 = vsel %vm244_vm5, %v317_v19, 0.0  ;;  %v334_v22 = vsel %vm332_vm8, %v331_v11, %v330_v10 }
  0xe6   : > { %v345_v24 = vsel %vm343_vm10, %v342_v14, %v341_v13  ;;  %v321_v25 = vmax.f32 %v1097_v4, %v319_v20  ;;  %v338_v26 = vsel %vm336_vm9, %v334_v22, 0.0  ;;  %v333_v27 = vsel %vm332_vm8, %v330_v10, %v331_v11 }
  0xe7   : > { %v328_v23 = vmax.f32 %v320_v17, %v326_v18  ;;  %v348_v30 = vsel %vm346_vm11, %v345_v24, 0.0  ;;  %v344_v33 = vsel %vm343_vm10, %v341_v13, %v342_v14 }
  0xe8   : > { %v329_v29 = vmax.f32 %v321_v25, %v324_v21 }
  0xe9   : > { %v339_v28 = vmax.f32 %v328_v23, %v333_v27 }
  0xea   : > { %v340_v32 = vmax.f32 %v329_v29, %v338_v26 }
  0xeb   : > { %v1135_v31 = vmax.f32 %v339_v28, %v348_v30 }
  0xec   : > { %v1141_v34 = vmax.f32 %v340_v32, %v344_v33 }
  0xed   : > { %352 = vrot.lane.b32.xlu0 %v1135_v31, %s830_s20 }
  0xee   : > { %354 = vrot.lane.b32.xlu1 %v1141_v34, %s830_s20 }
  0xef   : > { %v297_v35 = vpop.permute.xlu1 %296  ;;  %v305_v36 = vpop.permute.xlu0 %304 }
  0xf0   : > { %v300_v37 = vsel %vm264_vm6, %v297_v35, 0.0  ;;  %v308_v41 = vsel %vm273_vm7, %v305_v36, 0.0 }
  0xf1   : > { %v302_v40 = vmax.f32 %v1068_v52, %v300_v37  ;;  %360 = vrot.lane.b32.xlu0 %v1135_v31, %s831_s8 }
  0xf2   : > { %362 = vrot.lane.b32.xlu1 %v1141_v34, %s831_s8 }
  0xf3   : > { %v299_v42 = vpop.permute.xlu1 %298  ;;  %v310_v43 = vmax.f32 %v302_v40, %v308_v41 }
  0xf4   : > { %v301_v44 = vsel %vm264_vm6, %v299_v42, 0.0 }
  0xf5   : > { %368 = vrot.lane.b32.xlu0 %v1135_v31, %s832_s17  ;;  %v303_v45 = vmax.f32 %v1074_v53, %v301_v44  ;;  %v1162_v47 = vsub.f32 %v310_v43, %v1046_v38 }
  0xf6   : > { %370 = vrot.lane.b32.xlu1 %v1141_v34, %s832_s17 }
  0xf7   : > { %v307_v46 = vpop.permute.xlu1 %306  ;;  %v386_v51 = vrot.slane %v1162_v47, 1  ;;  %v394_v38 = vrot.slane %v1162_v47, 7  ;;  %v402_v58 = vrot.slane %v1162_v47, 2  ;;  %v410_v61 = vrot.slane %v1162_v47, 6 }
  0xf8   : > { %v309_v48 = vsel %vm273_vm7, %v307_v46, 0.0 }
  0xf9   : > { %v311_v49 = vmax.f32 %v303_v45, %v309_v48  ;;  %377 = vrot.lane.b32.xlu0 %v1135_v31, %s833_s28 }
  0xfa   : > { %379 = vrot.lane.b32.xlu1 %v1141_v34, %s833_s28 }
  0xfb   : > { %v1169_v50 = vsub.f32 %v311_v49, %v1048_v39 }
  0xfd   : > { %v387_v52 = vrot.slane %v1169_v50, 1  ;;  %v395_v53 = vrot.slane %v1169_v50, 7  ;;  %v403_v55 = vrot.slane %v1169_v50, 2  ;;  %v411_v56 = vrot.slane %v1169_v50, 6 }
  0xfe   : > { %v461_v7 = vadd.f32 %v1169_v50, %v1162_v47 }
  0xff   : > { %v388_v57 = vsel %vm240_vm2, %v386_v51, %v387_v52  ;;  %v397_v39 = vsel %vm251_vm3, %v395_v53, %v394_v38  ;;  %v389_v62 = vsel %vm240_vm2, %v387_v52, %v386_v51  ;;  %v405_v0 = vsel %vm332_vm8, %v403_v55, %v402_v58 }
 0x100   : > { %v392_v59 = vmax.f32 %v1162_v47, %v388_v57  ;;  %v398_v60 = vsel %vm254_vm4, %v397_v39, 0.0  ;;  %v391_v63 = vsel %vm244_vm5, %v389_v62, 0.0  ;;  %v413_v3 = vsel %vm343_vm10, %v411_v56, %v410_v61 }
 0x101   : > { %v393_v5 = vmax.f32 %v1169_v50, %v391_v63  ;;  %v407_v6 = vsel %vm336_vm9, %v405_v0, 0.0  ;;  %v404_v8 = vsel %vm332_vm8, %v402_v58, %v403_v55  ;;  %v396_v9 = vsel %vm251_vm3, %v394_v38, %v395_v53 }
 0x102   : > { %v400_v2 = vmax.f32 %v392_v59, %v398_v60  ;;  %v414_v13 = vsel %vm346_vm11, %v413_v3, 0.0  ;;  %v412_v16 = vsel %vm343_vm10, %v410_v61, %v411_v56  ;;  %v462_v17 = vrot.slane %v461_v7, 4 }
 0x103   : > { %v401_v11 = vmax.f32 %v393_v5, %v396_v9 }
 0x104   : > { %v408_v10 = vmax.f32 %v400_v2, %v404_v8  ;;  %v463_v18 = vadd.f32 %v462_v17, %v461_v7 }
 0x105   : > { %v409_v15 = vmax.f32 %v401_v11, %v407_v6 }
 0x106   : > { %v1205_v14 = vmax.f32 %v408_v10, %v414_v13  ;;  %v464_v19 = vrot.slane %v463_v18, 2 }
 0x107   : > { %v1211_v12 = vmax.f32 %v409_v15, %v412_v16 }
 0x108   : > { %418 = vrot.lane.b32.xlu0 %v1205_v14, %s830_s20  ;;  %v465_v20 = vadd.f32 %v464_v19, %v463_v18 }
 0x109   : > { %420 = vrot.lane.b32.xlu1 %v1211_v12, %s830_s20 }
 0x10a   : > { %v466_v21 = vrot.slane %v465_v20, 1 }
 0x10c   : > { %426 = vrot.lane.b32.xlu0 %v1205_v14, %s831_s8  ;;  %v467_v22 = vadd.f32 %v466_v21, %v465_v20 }
 0x10d   : > { %428 = vrot.lane.b32.xlu1 %v1211_v12, %s831_s8 }
 0x110   : > { %434 = vrot.lane.b32.xlu0 %v1205_v14, %s832_s17 }
 0x111   : > { %436 = vrot.lane.b32.xlu1 %v1211_v12, %s832_s17 }
 0x114   : > { %442 = vrot.lane.b32.xlu0 %v1205_v14, %s833_s28 }
 0x115   : > { %444 = vrot.lane.b32.xlu1 %v1211_v12, %s833_s28 }
 0x139   : > { %468 = vadd.xlane.f32.xlu1 %v467_v22 }
 0x15f   : > { %v353_v23 = vpop.permute.xlu0 %352 }
 0x160   : > { %v355_v24 = vpop.permute.xlu1 %354  ;;  %v356_v26 = vsel %vm264_vm6, %v353_v23, 0.0 }
 0x161   : > { %v357_v28 = vsel %vm264_vm6, %v355_v24, 0.0  ;;  %v358_v30 = vmax.f32 %v1135_v31, %v356_v26 }
 0x162   : > { %v359_v36 = vmax.f32 %v1141_v34, %v357_v28 }
 0x163   : > { %v361_v25 = vpop.permute.xlu0 %360 }
 0x164   : > { %v363_v27 = vpop.permute.xlu1 %362  ;;  %v364_v29 = vsel %vm273_vm7, %v361_v25, 0.0 }
 0x165   : > { %v365_v33 = vsel %vm273_vm7, %v363_v27, 0.0  ;;  %v366_v37 = vmax.f32 %v358_v30, %v364_v29 }
 0x166   : > { %v367_v42 = vmax.f32 %v359_v36, %v365_v33 }
 0x167   : > { %v369_v32 = vpop.permute.xlu0 %368 }
 0x168   : > { %v373_v35 = vsel %vm372_vm12, %v369_v32, 0.0  ;;  %v371_v40 = vpop.permute.xlu1 %370 }
 0x169   : > { %v374_v41 = vsel %vm372_vm12, %v371_v40, 0.0  ;;  %v375_v43 = vmax.f32 %v366_v37, %v373_v35 }
 0x16a   : > { %v376_v45 = vmax.f32 %v367_v42, %v374_v41 }
 0x16b   : > { %v378_v44 = vpop.permute.xlu0 %377 }
 0x16c   : > { %v382_v31 = vsel %vm381_vm13, %v378_v44, 0.0  ;;  %v380_v48 = vpop.permute.xlu1 %379 }
 0x16d   : > { %v384_v46 = vmax.f32 %v375_v43, %v382_v31  ;;  %v383_v49 = vsel %vm381_vm13, %v380_v48, 0.0 }
 0x16e   : > { %v385_v51 = vmax.f32 %v376_v45, %v383_v49 }
 0x16f   : > { %v450_v34 = vmul.f32 %v384_v46, %v1162_v47 }
 0x170   : > { %v451_v52 = vmul.f32 %v385_v51, %v1169_v50 }
 0x172   : > { %v452_v38 = vadd.f32 %v451_v52, %v450_v34 }
 0x174   : > { %v453_v53 = vrot.slane %v452_v38, 4 }
 0x176   : > { %v454_v55 = vadd.f32 %v453_v53, %v452_v38 }
 0x178   : > { %v455_v56 = vrot.slane %v454_v55, 2 }
 0x17a   : > { %v419_v57 = vpop.permute.xlu0 %418  ;;  %v456_v39 = vadd.f32 %v455_v56, %v454_v55 }
 0x17b   : > { %v421_v58 = vpop.permute.xlu1 %420  ;;  %v422_v61 = vsel %vm264_vm6, %v419_v57, 0.0 }
 0x17c   : > { %v457_v59 = vrot.slane %v456_v39, 1  ;;  %v423_v47 = vsel %vm264_vm6, %v421_v58, 0.0  ;;  %v424_v0 = vmax.f32 %v1205_v14, %v422_v61  ;;  %v481_v14 = vadd.f32 %v1097_v4, %v1094_v1 }
 0x17d   : > { %v425_v6 = vmax.f32 %v1211_v12, %v423_v47 }
 0x17e   : > { %v427_v60 = vpop.permute.xlu0 %426  ;;  %v458_v62 = vadd.f32 %v457_v59, %v456_v39  ;;  %v482_v21 = vrot.slane %v481_v14, 4 }
 0x17f   : > { %v429_v63 = vpop.permute.xlu1 %428  ;;  %v430_v50 = vsel %vm273_vm7, %v427_v60, 0.0 }
 0x180   : > { %459 = vadd.xlane.f32.xlu0 %v458_v62  ;;  %v431_v3 = vsel %vm273_vm7, %v429_v63, 0.0  ;;  %v432_v8 = vmax.f32 %v424_v0, %v430_v50  ;;  %v483_v24 = vadd.f32 %v482_v21, %v481_v14 }
 0x181   : > { %v433_v11 = vmax.f32 %v425_v6, %v431_v3 }
 0x182   : > { %v435_v2 = vpop.permute.xlu0 %434  ;;  %v484_v27 = vrot.slane %v483_v24, 2 }
 0x183   : > { %v438_v5 = vsel %vm372_vm12, %v435_v2, 0.0  ;;  %v437_v9 = vpop.permute.xlu1 %436 }
 0x184   : > { %v439_v10 = vsel %vm372_vm12, %v437_v9, 0.0  ;;  %v440_v13 = vmax.f32 %v432_v8, %v438_v5  ;;  %v485_v30 = vadd.f32 %v484_v27, %v483_v24 }
 0x185   : > { %v441_v7 = vmax.f32 %v433_v11, %v439_v10 }
 0x186   : > { %v443_v15 = vpop.permute.xlu0 %442  ;;  %v486_v54 = vrot.slane %v485_v30, 1 }
 0x187   : > { %v446_v16 = vsel %vm381_vm13, %v443_v15, 0.0  ;;  %v445_v18 = vpop.permute.xlu1 %444 }
 0x188   : > { %v448_v17 = vmax.f32 %v440_v13, %v446_v16  ;;  %v447_v12 = vsel %vm381_vm13, %v445_v18, 0.0  ;;  %v487_v35 = vadd.f32 %v486_v54, %v485_v30 }
 0x189   : > { %v449_v20 = vmax.f32 %v441_v7, %v447_v12 }
 0x18a   : > { %v470_v19 = vmul.f32 %v448_v17, %v1094_v1 }
 0x18b   : > { %v471_v22 = vmul.f32 %v449_v20, %v1097_v4 }
 0x18d   : > { %v472_v23 = vadd.f32 %v471_v22, %v470_v19 }
 0x18f   : > { %v473_v25 = vrot.slane %v472_v23, 4 }
 0x191   : > { %v474_v26 = vadd.f32 %v473_v25, %v472_v23 }
 0x193   : > { %v475_v28 = vrot.slane %v474_v26, 2 }
 0x195   : > { %v476_v29 = vadd.f32 %v475_v28, %v474_v26 }
 0x197   : > { %v477_v32 = vrot.slane %v476_v29, 1 }
 0x199   : > { %v478_v33 = vadd.f32 %v477_v32, %v476_v29 }
 0x19b   : > { %479 = vadd.xlane.f32.xlu0 %v478_v33 }
 0x19f   : > { %488 = vadd.xlane.f32.xlu0 %v487_v35 }
 0x1c2   : > { %v469_v36 = vpop.xlane.xlu1 %468 }
 0x209   : > { %v460_v1 = vpop.xlane.xlu0 %459 }
 0x20a   : > { %v491_v37 = vsel %vm490_vm14, %v460_v1, %v469_v36 }
 0x224   : > { %v480_v4 = vpop.xlane.xlu0 %479 }
 0x225   : > { %v493_v40 = vsel %vm492_vm15, %v491_v37, %v480_v4 }
 0x228   : > { %v489_v41 = vpop.xlane.xlu0 %488 }
 0x229   : > { %v495_v42 = vsel %vm494_vm0, %v493_v40, %v489_v41 }
 0x22a   : > { %497 = vst.msk [vmem:[%s200_s26] sm:$0x1] %vm496_vm1, %v495_v42 }
 0x22b   : > { %766 = shalt.err (!%p763_p4)
}
 0x22c   : > { %s767_s24 = scalar_lea.hbm %s1278_s7, 16  ;;  %s771_s3 = scalar_lea.hbm %s1317_s2, 32 }
 0x22d   : > { %p768_p3 = scmp.ne.s32.totalorder %s1278_s7, %s767_s24  ;;  %p772_p12 = scmp.lt.s32.totalorder %s1278_s7, %s1317_s2 }
 0x22e   : > { %p773_p8 = scmp.lt.s32.totalorder %s771_s3, %s767_s24 }
 0x22f   : > { %p769_p5 = pnand %p768_p3, %p1327_p1 }
 0x230   : > { %p774_p6 = por %p773_p8, %p772_p12 }
 0x231   : > { %p770_p11 = pneg %p769_p5 }
 0x233   : > { %p775_p13 = pnand %p774_p6, %p770_p11 }
 0x235   : > { %778 = shalt.err (!%p775_p13)
}
 0x236   : > { %633 = dma.vmem_to_hbm [thread:$0]  (%p1327_p1), %s512_s27, 16, %s1278_s7, %s499_s14  }
 0x237 PF: > { %s523_s8 = sand.u32 1, %s809_s9   ;;  %p1328_p9 = scmp.ne.s32.totalorder %s1323_s22, 0 }
 0x238   : > { %p1329_p7 = scmp.ge.s32.totalorder %s821_s12, 2  ;;  %s524_s17 = scalar_lea.sflag [#allocation4], %s523_s8 }
 0x23a   : > { %p643_p10 = pnand %p1329_p7, %p1328_p9 }
 0x23c   : > { %p644_p0 = pneg %p643_p10 }
 0x23e   : > { %804 = dma.done.wait (%p644_p0), %s524_s17, 16  }
 0x23f   : > { %806 = vsyncadd (%p644_p0), %s524_s17, 4294967280  ;;  %p18_p2 = scmp.ge.s32.totalorder %s875_s15, 4   ;;  %s1330_s9 = smov %s813_s10 }
 0x240   : > { %s1331_s10 = smov %s817_s11  ;;  %s1332_s11 = smov %s887_s18 }
 0x241   : > { %s1333_s12 = smov %s875_s15  ;;  %20 = sbr.rel (!%p18_p2) target bundleno = 7 (0x7), region = 86 }
 0x246   :  { %528 = vsyncpa [#allocation3], 1 }
 0x247   :  { %530 = vsyncpa [#allocation3 + $0x1], 1 }
 0x248   :  { %531 = vsyncpa [#allocation6], 1 }
 0x249   :  { %533 = vsyncpa [#allocation6 + $0x1], 1 }
 0x24a   :  { %534 = vsyncpa [#allocation4], 1 }
 0x24b   :  { %536 = vsyncpa [#allocation4 + $0x1], 1 }

</bundles_post_ra>
